<compile_context>
chip_gen: v7x
topology: tpu7x:2x2x1
jax: 0.10.0
libtpu: 0.0.40
codegen_flags: <defaults>
</compile_context>

<pallas_src>
import functools
import math
from typing import NamedTuple, Tuple

import jax
import jax.numpy as jnp
from jax.experimental import pallas as pl
from jax.experimental.pallas import tpu as pltpu


def _round_up(x: int, m: int) -> int:
    return ((x + m - 1) // m) * m


# ---------------------------------------------------------------------------
# Kernels
# ---------------------------------------------------------------------------

def _offset_set_center_kernel(e1_ref, e1o_ref, e2_ref, e2o_ref,
                              pre_top_ref, pre_bot_ref, post_ref, out_ref,
                              *, mxu_dtype):
    tb = out_ref.shape[0]
    # Row-stack the two set elements so each weight half is pushed to the MXU once.
    xc = jnp.concatenate([e1_ref[...], e2_ref[...]], axis=0).astype(mxu_dtype)    # (2*tb, E)
    xo = jnp.concatenate([e1o_ref[...], e2o_ref[...]], axis=0).astype(mxu_dtype)  # (2*tb, E)
    # cat([x, x_o], dim=1) @ pre_mats == x @ pre_top + x_o @ pre_bot   (exact)
    r = jnp.dot(xc, pre_top_ref[...].astype(mxu_dtype),
                preferred_element_type=jnp.float32)
    r = r + jnp.dot(xo, pre_bot_ref[...].astype(mxu_dtype),
                    preferred_element_type=jnp.float32)                            # (2*tb, Mp)
    # min(relu(a), relu(b)) == relu(min(a, b)); keep the VPU work in f32.
    combined = jnp.maximum(jnp.minimum(r[:tb], r[tb:]), 0.0)                       # (tb, Mp)
    out_ref[...] = jnp.dot(combined.astype(mxu_dtype),
                           post_ref[...].astype(mxu_dtype),
                           preferred_element_type=jnp.float32).astype(out_ref.dtype)


def _offset_set_no_center_kernel(e1o_ref, e2o_ref, pre_ref, post_ref, out_ref,
                                 *, mxu_dtype):
    tb = out_ref.shape[0]
    xo = jnp.concatenate([e1o_ref[...], e2o_ref[...]], axis=0).astype(mxu_dtype)   # (2*tb, E)
    r = jnp.dot(xo, pre_ref[...].astype(mxu_dtype),
                preferred_element_type=jnp.float32)                                # (2*tb, Mp)
    combined = jnp.maximum(jnp.minimum(r[:tb], r[tb:]), 0.0)                       # (tb, Mp)
    out_ref[...] = jnp.dot(combined.astype(mxu_dtype),
                           post_ref[...].astype(mxu_dtype),
                           preferred_element_type=jnp.float32).astype(out_ref.dtype)


# ---------------------------------------------------------------------------
# Parameter prep (one-time split + zero-pad of the weights)
# ---------------------------------------------------------------------------

class OffsetSetParams(NamedTuple):
    pre_parts: Tuple[jnp.ndarray, ...]   # (E, Mp) halves if use_center else single (E, Mp)
    post: jnp.ndarray                    # (Mp, Ep), zero-padded
    mode_dims: int
    expand_dims: int
    offset_use_center: bool


def prepare_offset_set_params(pre_mats, post_mats, offset_use_center=True):
    mode_dims, expand_dims = post_mats.shape
    expect_k = 2 * expand_dims if offset_use_center else expand_dims
    if pre_mats.shape != (expect_k, mode_dims):
        raise ValueError(
            f"pre_mats shape {pre_mats.shape} inconsistent with "
            f"offset_use_center={offset_use_center}; expected {(expect_k, mode_dims)}")

    m_pad = _round_up(mode_dims, 128)
    e_pad = _round_up(expand_dims, 128)
    pad_m = ((0, 0), (0, m_pad - mode_dims))
    if offset_use_center:
        pre_parts = (jnp.pad(pre_mats[:expand_dims], pad_m),
                     jnp.pad(pre_mats[expand_dims:], pad_m))
    else:
        pre_parts = (jnp.pad(pre_mats, pad_m),)
    post = jnp.pad(post_mats, ((0, m_pad - mode_dims), (0, e_pad - expand_dims)))
    return OffsetSetParams(pre_parts, post, mode_dims, expand_dims, offset_use_center)


# ---------------------------------------------------------------------------
# Forward
# ---------------------------------------------------------------------------

def offset_set_forward(embeds1, embeds1_o, embeds2, embeds2_o, params,
                       *, block_rows=256, mxu_dtype=jnp.float32):
    """JAX/Pallas equivalent of OffsetSet.forward for the two-input case."""
    # TODO(synk): optional third set element (embeds3/embeds3_o) branch of the original
    #             module is not wired into the kernel; extend with a third row block and
    #             an extra jnp.minimum if needed.
    B, e_in = embeds1_o.shape
    assert e_in == params.expand_dims, "embedding width must equal expand_dims"
    if params.offset_use_center:
        assert embeds1.shape == (B, e_in) and embeds2.shape == (B, e_in)
    assert embeds2_o.shape == (B, e_in)

    m_pad, e_pad = params.post.shape

    tb = min(_round_up(block_rows, 8), _round_up(B, 8))
    b_pad = _round_up(B, tb)

    def _pad_rows(x):
        return x if x.shape[0] == b_pad else jnp.pad(x, ((0, b_pad - x.shape[0]), (0, 0)))

    grid = (b_pad // tb,)
    row_spec = pl.BlockSpec((tb, e_in), lambda i: (i, 0))
    pre_spec = pl.BlockSpec((e_in, m_pad), lambda i: (0, 0))      # weights stay resident
    post_spec = pl.BlockSpec((m_pad, e_pad), lambda i: (0, 0))
    out_spec = pl.BlockSpec((tb, e_pad), lambda i: (i, 0))        # lane-dense output store

    if params.offset_use_center:
        kernel = functools.partial(_offset_set_center_kernel, mxu_dtype=mxu_dtype)
        row_inputs = (_pad_rows(embeds1), _pad_rows(embeds1_o),
                      _pad_rows(embeds2), _pad_rows(embeds2_o))
    else:
        kernel = functools.partial(_offset_set_no_center_kernel, mxu_dtype=mxu_dtype)
        row_inputs = (_pad_rows(embeds1_o), _pad_rows(embeds2_o))

    in_specs = ([row_spec] * len(row_inputs)
                + [pre_spec] * len(params.pre_parts)
                + [post_spec])
    operands = row_inputs + params.pre_parts + (params.post,)

    # VMEM budget from actual tile sizes (double-buffered row tiles + resident weights
    # + double-buffered output), with headroom, capped so it also fits v7x's 64 MiB.
    elem_bytes = 4
    tile_bytes = (len(row_inputs) * 2 * tb * e_in
                  + len(params.pre_parts) * e_in * m_pad
                  + m_pad * e_pad
                  + 2 * tb * e_pad) * elem_bytes
    vmem_limit = int(min(max(2 * tile_bytes + (4 << 20), 8 << 20), 48 << 20))

    out_padded = pl.pallas_call(
        kernel,
        out_shape=jax.ShapeDtypeStruct((b_pad, e_pad), jnp.float32),
        grid=grid,
        in_specs=in_specs,
        out_specs=out_spec,
        compiler_params=pltpu.CompilerParams(
            dimension_semantics=("parallel",),   # lets v7x shard rows across its 2 TCs
            vmem_limit_bytes=vmem_limit,
        ),
    )(*operands)

    return out_padded[:B, :params.expand_dims]


# ---------------------------------------------------------------------------
# Demo / correctness check
# ---------------------------------------------------------------------------

def _xavier_uniform(key, shape, dtype=jnp.float32):
    fan_in, fan_out = shape[0], shape[1]
    bound = math.sqrt(6.0 / (fan_in + fan_out))
    return jax.random.uniform(key, shape, dtype=dtype, minval=-bound, maxval=bound)


if __name__ == "__main__":
    B = 8
    expand_dims = 32
    mode_dims = 64

    key = jax.random.PRNGKey(0)
    k1, k2, k3, k4, kp1, kp2 = jax.random.split(key, 6)

    embeds1   = jax.random.normal(k1, (B, expand_dims), dtype=jnp.float32)
    embeds1_o = jax.random.normal(k2, (B, expand_dims), dtype=jnp.float32)
    embeds2   = jax.random.normal(k3, (B, expand_dims), dtype=jnp.float32)
    embeds2_o = jax.random.normal(k4, (B, expand_dims), dtype=jnp.float32)

    # Deterministic xavier_uniform-initialized parameters (same shapes as nn.Parameter).
    pre_mats  = _xavier_uniform(kp1, (expand_dims * 2, mode_dims))
    post_mats = _xavier_uniform(kp2, (mode_dims, expand_dims))

    # --- offset_use_center=True path -------------------------------------------------
    params = prepare_offset_set_params(pre_mats, post_mats, offset_use_center=True)
    out = jax.block_until_ready(
        offset_set_forward(embeds1, embeds1_o, embeds2, embeds2_o, params))

    x1 = jnp.concatenate([embeds1, embeds1_o], axis=1)
    x2 = jnp.concatenate([embeds2, embeds2_o], axis=1)
    t1 = jnp.maximum(x1 @ pre_mats, 0.0)
    t2 = jnp.maximum(x2 @ pre_mats, 0.0)
    ref = jnp.minimum(t1, t2) @ post_mats
    assert out.shape == (B, expand_dims)
    assert jnp.allclose(out, ref, atol=1e-5, rtol=1e-5), "mismatch vs reference (center)"

    # --- offset_use_center=False path -------------------------------------------------
    pre_mats_nc = _xavier_uniform(kp1, (expand_dims, mode_dims))
    params_nc = prepare_offset_set_params(pre_mats_nc, post_mats, offset_use_center=False)
    out_nc = jax.block_until_ready(
        offset_set_forward(embeds1, embeds1_o, embeds2, embeds2_o, params_nc))
    ref_nc = jnp.minimum(jnp.maximum(embeds1_o @ pre_mats_nc, 0.0),
                         jnp.maximum(embeds2_o @ pre_mats_nc, 0.0)) @ post_mats
    assert out_nc.shape == (B, expand_dims)
    assert jnp.allclose(out_nc, ref_nc, atol=1e-5, rtol=1e-5), "mismatch vs reference (no-center)"

    print("KERNEL_OK")
</pallas_src>

<mosaic_0001>
module attributes {stable_mosaic.version = 11 : i64} {
  func.func @_offset_set_center_kernel(%arg0: i32, %arg1: memref<8x32xf32, #tpu.memory_space<vmem>>, %arg2: memref<8x32xf32, #tpu.memory_space<vmem>>, %arg3: memref<8x32xf32, #tpu.memory_space<vmem>>, %arg4: memref<8x32xf32, #tpu.memory_space<vmem>>, %arg5: memref<32x128xf32, #tpu.memory_space<vmem>>, %arg6: memref<32x128xf32, #tpu.memory_space<vmem>>, %arg7: memref<128x128xf32, #tpu.memory_space<vmem>>, %arg8: memref<8x128xf32, #tpu.memory_space<vmem>>) attributes {dimension_semantics = [#tpu.dimension_semantics<parallel>], iteration_bounds = array<i64: 1>, scalar_prefetch = 0 : i64, scratch_operands = 0 : i64, tpu.core_type = #tpu.core_type<tc>, window_params = [{transform_indices = @transform_0, window_bounds = array<i64: 8, 32>}, {transform_indices = @transform_1, window_bounds = array<i64: 8, 32>}, {transform_indices = @transform_2, window_bounds = array<i64: 8, 32>}, {transform_indices = @transform_3, window_bounds = array<i64: 8, 32>}, {pipeline_mode = #tpu.pipeline_mode<synchronous>, transform_indices = @transform_4, window_bounds = array<i64: 32, 128>}, {pipeline_mode = #tpu.pipeline_mode<synchronous>, transform_indices = @transform_5, window_bounds = array<i64: 32, 128>}, {pipeline_mode = #tpu.pipeline_mode<synchronous>, transform_indices = @transform_6, window_bounds = array<i64: 128, 128>}, {transform_indices = @transform_7, window_bounds = array<i64: 8, 128>}]} {
    %c0 = arith.constant 0 : index
    %c0_0 = arith.constant 0 : index
    %0 = vector.load %arg1[%c0, %c0_0] : memref<8x32xf32, #tpu.memory_space<vmem>>, vector<8x32xf32>
    %c0_1 = arith.constant 0 : index
    %c0_2 = arith.constant 0 : index
    %1 = vector.load %arg3[%c0_1, %c0_2] : memref<8x32xf32, #tpu.memory_space<vmem>>, vector<8x32xf32>
    %2 = tpu.concatenate %0, %1 in 0 : vector<8x32xf32>, vector<8x32xf32> -> vector<16x32xf32>
    %c0_3 = arith.constant 0 : index
    %c0_4 = arith.constant 0 : index
    %3 = vector.load %arg2[%c0_3, %c0_4] : memref<8x32xf32, #tpu.memory_space<vmem>>, vector<8x32xf32>
    %c0_5 = arith.constant 0 : index
    %c0_6 = arith.constant 0 : index
    %4 = vector.load %arg4[%c0_5, %c0_6] : memref<8x32xf32, #tpu.memory_space<vmem>>, vector<8x32xf32>
    %5 = tpu.concatenate %3, %4 in 0 : vector<8x32xf32>, vector<8x32xf32> -> vector<16x32xf32>
    %c0_7 = arith.constant 0 : index
    %c0_8 = arith.constant 0 : index
    %6 = vector.load %arg5[%c0_7, %c0_8] : memref<32x128xf32, #tpu.memory_space<vmem>>, vector<32x128xf32>
    %cst = arith.constant dense<0.000000e+00> : vector<16x128xf32>
    %7 = tpu.matmul %2, %6, %cst {dimension_numbers = #tpu.dot_dimension_numbers<[1], [0], [0], [1], [0, 0, 1, 1], [], []>} : vector<16x32xf32>, vector<32x128xf32>, vector<16x128xf32> -> vector<16x128xf32>
    %c0_9 = arith.constant 0 : index
    %c0_10 = arith.constant 0 : index
    %8 = vector.load %arg6[%c0_9, %c0_10] : memref<32x128xf32, #tpu.memory_space<vmem>>, vector<32x128xf32>
    %cst_11 = arith.constant dense<0.000000e+00> : vector<16x128xf32>
    %9 = tpu.matmul %5, %8, %cst_11 {dimension_numbers = #tpu.dot_dimension_numbers<[1], [0], [0], [1], [0, 0, 1, 1], [], []>} : vector<16x32xf32>, vector<32x128xf32>, vector<16x128xf32> -> vector<16x128xf32>
    %10 = arith.addf %7, %9 : vector<16x128xf32>
    %11 = vector.extract_strided_slice %10 {offsets = [0, 0], sizes = [8, 128], strides = [1, 1]} : vector<16x128xf32> to vector<8x128xf32>
    %12 = vector.extract_strided_slice %10 {offsets = [8, 0], sizes = [8, 128], strides = [1, 1]} : vector<16x128xf32> to vector<8x128xf32>
    %13 = arith.minimumf %11, %12 : vector<8x128xf32>
    %cst_12 = arith.constant 0.000000e+00 : f32
    %14 = vector.broadcast %cst_12 : f32 to vector<8x128xf32>
    %15 = arith.maximumf %13, %14 : vector<8x128xf32>
    %c0_13 = arith.constant 0 : index
    %c0_14 = arith.constant 0 : index
    %16 = vector.load %arg7[%c0_13, %c0_14] : memref<128x128xf32, #tpu.memory_space<vmem>>, vector<128x128xf32>
    %cst_15 = arith.constant dense<0.000000e+00> : vector<8x128xf32>
    %17 = tpu.matmul %15, %16, %cst_15 {dimension_numbers = #tpu.dot_dimension_numbers<[1], [0], [0], [1], [0, 0, 1, 1], [], []>} : vector<8x128xf32>, vector<128x128xf32>, vector<8x128xf32> -> vector<8x128xf32>
    %c0_16 = arith.constant 0 : index
    %c0_17 = arith.constant 0 : index
    %18 = vector.load %arg8[%c0_16, %c0_17] : memref<8x128xf32, #tpu.memory_space<vmem>>, vector<8x128xf32>
    tpu.vector_store %arg8[%c0_16, %c0_17], %17 {strides = array<i32>} : memref<8x128xf32, #tpu.memory_space<vmem>>, vector<8x128xf32>,
    return
  }
  func.func @transform_0(%arg0: i32) -> (i32, i32) {
    %c0_i32 = arith.constant 0 : i32
    %c0_i32_0 = arith.constant 0 : i32
    return %arg0, %c0_i32 : i32, i32
  }
  func.func @transform_1(%arg0: i32) -> (i32, i32) {
    %c0_i32 = arith.constant 0 : i32
    %c0_i32_0 = arith.constant 0 : i32
    return %arg0, %c0_i32 : i32, i32
  }
  func.func @transform_2(%arg0: i32) -> (i32, i32) {
    %c0_i32 = arith.constant 0 : i32
    %c0_i32_0 = arith.constant 0 : i32
    return %arg0, %c0_i32 : i32, i32
  }
  func.func @transform_3(%arg0: i32) -> (i32, i32) {
    %c0_i32 = arith.constant 0 : i32
    %c0_i32_0 = arith.constant 0 : i32
    return %arg0, %c0_i32 : i32, i32
  }
  func.func @transform_4(%arg0: i32) -> (i32, i32) {
    %c0_i32 = arith.constant 0 : i32
    %c0_i32_0 = arith.constant 0 : i32
    %c0_i32_1 = arith.constant 0 : i32
    return %c0_i32, %c0_i32_0 : i32, i32
  }
  func.func @transform_5(%arg0: i32) -> (i32, i32) {
    %c0_i32 = arith.constant 0 : i32
    %c0_i32_0 = arith.constant 0 : i32
    %c0_i32_1 = arith.constant 0 : i32
    return %c0_i32, %c0_i32_0 : i32, i32
  }
  func.func @transform_6(%arg0: i32) -> (i32, i32) {
    %c0_i32 = arith.constant 0 : i32
    %c0_i32_0 = arith.constant 0 : i32
    %c0_i32_1 = arith.constant 0 : i32
    return %c0_i32, %c0_i32_0 : i32, i32
  }
  func.func @transform_7(%arg0: i32) -> (i32, i32) {
    %c0_i32 = arith.constant 0 : i32
    %c0_i32_0 = arith.constant 0 : i32
    return %arg0, %c0_i32 : i32, i32
  }
}

</mosaic_0001>

<bundles_post_ra>
// kernel: tpu_custom_call.1
= control target key start
LH: loop header
LB: loop body
LE: loop exit
PB: predicated region body
PF: predicated region fallthrough
CT: control target
= control target key end

     0   :  { %12 = vsyncpa [#allocation3], 0  ;;  %s867_s0 = inlined_call_operand.hbm [shape: f32[8,32], index: 0, kind: input, shape index: {}]   ;;  %s868_s1 = inlined_call_operand.hbm [shape: f32[8,32], index: 1, kind: input, shape index: {}]   ;;  %s869_s2 = inlined_call_operand.hbm [shape: f32[8,32], index: 2, kind: input, shape index: {}]   ;;  %s870_s3 = inlined_call_operand.vmem [shape: f32[8,32], index: 3, kind: input, shape index: {}]   ;;  %s871_s4 = inlined_call_operand.hbm [shape: f32[32,128], index: 4, kind: input, shape index: {}]   ;;  %s872_s5 = inlined_call_operand.hbm [shape: f32[32,128], index: 5, kind: input, shape index: {}]   ;;  %s873_s6 = inlined_call_operand.hbm [shape: f32[128,128], index: 6, kind: input, shape index: {}]   ;;  %s874_s7 = inlined_call_operand.hbm [shape: f32[8,128], index: 7, kind: output, shape index: {}]  }
   0x1   :  { %13 = vsyncpa [#allocation6], 0 }
   0x2   :  { %14 = vsyncpa [#allocation9], 0 }
   0x3   :  { %15 = vsyncpa [#allocation12], 0 }
   0x4   :  { %16 = vsyncpa [#allocation4], 0  ;;  %s693_s24 = smov [#allocation5]   ;;  %s694_s26 = smov [#allocation8]  }
   0x5   :  { %s33_s25 = sshll.u32 %s693_s24, 4  ;;  %s54_s27 = sshll.u32 %s694_s26, 4  ;;  %s34_s25 = int_to_ptr.vmem [resolvable:$true] %s33_s25  ;;  %s745_s27 = int_to_ptr.vmem [resolvable:$true] %s54_s27 }
   0x6   :  { %s529_s30 = scalar_lea.hbm %s868_s1, 128 }
   0x7   :  { %p530_p0 = scmp.ne.s32.totalorder %s868_s1, %s529_s30  ;;  %p533_p1 = scmp.lt.u32.totalorder %s529_s30, %s868_s1 }
   0x9   :  { %p535_p2 = pnand %p533_p1, %p530_p0 }
   0xb   :  { %538 = shalt.err (!%p535_p2)
}
   0xc   :  { %s539_s12 = scalar_lea.vmem %s34_s25, 128  ;;  %p544_p4 = scmp.lt.s32.totalorder %s34_s25, %s34_s25 }
   0xd   :  { %p540_p3 = scmp.ne.s32.totalorder %s34_s25, %s539_s12  ;;  %p545_p5 = scmp.lt.s32.totalorder %s539_s12, %s539_s12 }
   0xf   :  { %p546_p6 = por %p545_p5, %p544_p4 }
  0x11   :  { %p547_p7 = pnand %p546_p6, %p540_p3 }
  0x13   :  { %550 = shalt.err (!%p547_p7)
}
  0x14   :  { %36 = dma.hbm_to_vmem [thread:$0]  %s868_s1, 128, %s34_s25, [#allocation6]  }
  0x15   :  { %s551_s17 = scalar_lea.hbm %s871_s4, 512 }
  0x16   :  { %p552_p8 = scmp.ne.s32.totalorder %s871_s4, %s551_s17  ;;  %p555_p9 = scmp.lt.u32.totalorder %s551_s17, %s871_s4 }
  0x18   :  { %p557_p10 = pnand %p555_p9, %p552_p8 }
  0x1a   :  { %560 = shalt.err (!%p557_p10)
}
  0x1b   :  { %s561_s22 = scalar_lea.vmem %s745_s27, 512  ;;  %p566_p12 = scmp.lt.s32.totalorder %s745_s27, %s745_s27 }
  0x1c   :  { %p562_p11 = scmp.ne.s32.totalorder %s745_s27, %s561_s22  ;;  %p567_p13 = scmp.lt.s32.totalorder %s561_s22, %s561_s22 }
  0x1e   :  { %p568_p0 = por %p567_p13, %p566_p12 }
  0x20   :  { %p569_p1 = pnand %p568_p0, %p562_p11 }
  0x22   :  { %572 = shalt.err (!%p569_p1)
}
  0x23   :  { %s695_s1 = smov 128   ;;  %s696_s23 = smov 8  }
  0x24   :  { %60 = dma.hbm_to_vmem [thread:$0]  %s871_s4, 512, %s745_s27, [#allocation9], %s695_s1, %s695_s1, %s696_s23  }
  0x25   :  { %s697_s26 = smov [#allocation2]   ;;  %s698_s29 = smov [#allocation7]  }
  0x26   :  { %s23_s28 = sshll.u32 %s697_s26, 4  ;;  %s43_s30 = sshll.u32 %s698_s29, 4  ;;  %s24_s28 = int_to_ptr.vmem [resolvable:$true] %s23_s28  ;;  %s44_s30 = int_to_ptr.vmem [resolvable:$true] %s43_s30 }
  0x27   :  { %s573_s10 = scalar_lea.hbm %s867_s0, 128 }
  0x28   :  { %p574_p2 = scmp.ne.s32.totalorder %s867_s0, %s573_s10  ;;  %p577_p3 = scmp.lt.u32.totalorder %s573_s10, %s867_s0 }
  0x2a   :  { %p579_p4 = pnand %p577_p3, %p574_p2 }
  0x2c   :  { %582 = shalt.err (!%p579_p4)
}
  0x2d   :  { %s583_s4 = scalar_lea.vmem %s24_s28, 128  ;;  %p588_p6 = scmp.lt.s32.totalorder %s24_s28, %s24_s28 }
  0x2e   :  { %p584_p5 = scmp.ne.s32.totalorder %s24_s28, %s583_s4  ;;  %p589_p7 = scmp.lt.s32.totalorder %s583_s4, %s583_s4 }
  0x30   :  { %p590_p8 = por %p589_p7, %p588_p6 }
  0x32   :  { %p591_p9 = pnand %p590_p8, %p584_p5 }
  0x34   :  { %594 = shalt.err (!%p591_p9)
}
  0x35   :  { %26 = dma.hbm_to_vmem [thread:$0]  %s867_s0, 128, %s24_s28, [#allocation3]  }
  0x36   :  { %s595_s18 = scalar_lea.hbm %s869_s2, 128 }
  0x37   :  { %p596_p10 = scmp.ne.s32.totalorder %s869_s2, %s595_s18  ;;  %p599_p11 = scmp.lt.u32.totalorder %s595_s18, %s869_s2 }
  0x39   :  { %p601_p12 = pnand %p599_p11, %p596_p10 }
  0x3b   :  { %604 = shalt.err (!%p601_p12)
}
  0x3c   :  { %s605_s24 = scalar_lea.vmem %s44_s30, 128  ;;  %p610_p0 = scmp.lt.s32.totalorder %s44_s30, %s44_s30 }
  0x3d   :  { %p606_p13 = scmp.ne.s32.totalorder %s44_s30, %s605_s24  ;;  %p611_p1 = scmp.lt.s32.totalorder %s605_s24, %s605_s24 }
  0x3f   :  { %p612_p2 = por %p611_p1, %p610_p0 }
  0x41   :  { %p613_p3 = pnand %p612_p2, %p606_p13 }
  0x43   :  { %616 = shalt.err (!%p613_p3)
}
  0x44   :  { %46 = dma.hbm_to_vmem [thread:$0]  %s869_s2, 128, %s44_s30, [#allocation6]  }
  0x45   :  { %s699_s26 = smov [#allocation10]   ;;  %s700_s29 = smov [#allocation11]  }
  0x46   :  { %s66_s28 = sshll.u32 %s699_s26, 4  ;;  %s78_s8 = sshll.u32 %s700_s29, 4  ;;  %s67_s28 = int_to_ptr.vmem [resolvable:$true] %s66_s28  ;;  %s803_s8 = int_to_ptr.vmem [resolvable:$true] %s78_s8 }
  0x47   :  { %s617_s11 = scalar_lea.hbm %s872_s5, 512 }
  0x48   :  { %p618_p4 = scmp.ne.s32.totalorder %s872_s5, %s617_s11  ;;  %p621_p5 = scmp.lt.u32.totalorder %s617_s11, %s872_s5 }
  0x4a   :  { %p623_p6 = pnand %p621_p5, %p618_p4 }
  0x4c   :  { %626 = shalt.err (!%p623_p6)
}
  0x4d   :  { %s627_s2 = scalar_lea.vmem %s67_s28, 512  ;;  %p632_p8 = scmp.lt.s32.totalorder %s67_s28, %s67_s28 }
  0x4e   :  { %p628_p7 = scmp.ne.s32.totalorder %s67_s28, %s627_s2  ;;  %p633_p9 = scmp.lt.s32.totalorder %s627_s2, %s627_s2 }
  0x50   :  { %p634_p10 = por %p633_p9, %p632_p8 }
  0x52   :  { %p635_p11 = pnand %p634_p10, %p628_p7 }
  0x54   :  { %638 = shalt.err (!%p635_p11)
}
  0x55   :  { %72 = dma.hbm_to_vmem [thread:$0]  %s872_s5, 512, %s67_s28, [#allocation9], %s695_s1, %s695_s1, %s696_s23  }
  0x56   :  { %s639_s17 = scalar_lea.hbm %s873_s6, 2048 }
  0x57   :  { %p640_p12 = scmp.ne.s32.totalorder %s873_s6, %s639_s17  ;;  %p643_p13 = scmp.lt.u32.totalorder %s639_s17, %s873_s6 }
  0x59   :  { %p645_p0 = pnand %p643_p13, %p640_p12 }
  0x5b   :  { %648 = shalt.err (!%p645_p0)
}
  0x5c   :  { %s649_s22 = scalar_lea.vmem %s803_s8, 2048  ;;  %p654_p2 = scmp.lt.s32.totalorder %s803_s8, %s803_s8 }
  0x5d   :  { %p650_p1 = scmp.ne.s32.totalorder %s803_s8, %s649_s22  ;;  %p655_p3 = scmp.lt.s32.totalorder %s649_s22, %s649_s22 }
  0x5f   :  { %p656_p4 = por %p655_p3, %p654_p2 }
  0x61   :  { %p657_p5 = pnand %p656_p4, %p650_p1 }
  0x63   :  { %660 = shalt.err (!%p657_p5)
}
  0x64   :  { %84 = dma.hbm_to_vmem [thread:$0]  %s873_s6, 2048, %s803_s8, [#allocation12], %s695_s1, %s695_s1, %s696_s23  }
  0x65   :  { %683 = dma.done.wait [#allocation3], 128  }
  0x66   :  { %684 = vsyncadd [#allocation3], 4294967168 }
  0x67   :  { %685 = dma.done.wait [#allocation6], 256  }
  0x68   :  { %686 = vsyncadd [#allocation6], 4294967040 }
  0x69   :  { %687 = dma.done.wait [#allocation9], 1024  }
  0x6a   :  { %688 = vsyncadd [#allocation9], 4294966272 }
  0x6b   :  { %689 = dma.done.wait [#allocation12], 2048  }
  0x6c   :  { %690 = vsyncadd [#allocation12], 4294965248  ;;  %v701_v0 = vmov 0.0|0.0   ;;  %vm115_vm0 = vcmask 261120   ;;  %v111_v1 = vld [vmem:[#allocation10] sm:$0xff]  ;;  %v112_v2 = vld [vmem:[#allocation10 + $0x8] sm:$0xff] }
  0x6d   :  { %491 = vmatprep.subr.bf16.mxu1 %v701_v0  ;;  %v113_v3 = vld [vmem:[#allocation10 + $0x10] sm:$0xff]  ;;  %v475_v4 = vpack.c.bf16 %v112_v2, %v111_v1  ;;  %v114_v5 = vld [vmem:[#allocation10 + $0x18] sm:$0xff]  ;;  %v107_v8 = vld [vmem:[#allocation8] sm:$0xff]  ;;  %vm702_vm1 = vmmov 0   ;;  %v703_v41 = vmov 0.0  }
  0x6e   :  { %v105_v6 = vld [vmem:[#allocation5] sm:$0xff]  ;;  %v479_v7 = vpack.c.bf16 %v114_v5, %v113_v3  ;;  %v108_v9 = vld [vmem:[#allocation8 + $0x8] sm:$0xff]  ;;  %v280_v10 = vld [vmem:[#allocation11] sm:$0xff]  ;;  %472 = vmatprep.mubr.msk.f32.mxu1 %vm702_vm1, %v703_v41 }
  0x6f   :  { %426 = vmatprep.mubr.msk.f32.mxu0 %vm115_vm0, %v105_v6  ;;  %476 = vmatprep.subr.bf16.mxu0 %v475_v4  ;;  %v281_v11 = vld [vmem:[#allocation11 + $0x8] sm:$0xff]  ;;  %v282_v12 = vld [vmem:[#allocation11 + $0x10] sm:$0xff]  ;;  %v483_v13 = vpack.c.bf16 %v108_v9, %v107_v8  ;;  %v283_v15 = vld [vmem:[#allocation11 + $0x18] sm:$0xff] }
  0x70   :  { %478 = vmatpush3.bf16.msra.mxu0 %v475_v4  ;;  %v492_v14 = vpack.c.bf16 %v281_v11, %v280_v10  ;;  %v109_v16 = vld [vmem:[#allocation8 + $0x10] sm:$0xff]  ;;  %v110_v17 = vld [vmem:[#allocation8 + $0x18] sm:$0xff]  ;;  %v495_v18 = vpack.c.bf16 %v283_v15, %v282_v12  ;;  %v106_v19 = vld [vmem:[%s870_s3] sm:$0xff]  ;;  %s704_s3 = smov [#allocation13]  }
  0x71   :  { %480 = vmatprep.subr.bf16.mxu0 %v479_v7  ;;  %v284_v20 = vld [vmem:[#allocation11 + $0x20] sm:$0xff]  ;;  %v285_v21 = vld [vmem:[#allocation11 + $0x28] sm:$0xff]  ;;  %v487_v22 = vpack.c.bf16 %v110_v17, %v109_v16  ;;  %v286_v25 = vld [vmem:[#allocation11 + $0x30] sm:$0xff]  ;;  %s373_s23 = sshll.u32 %s704_s3, 4  ;;  %s374_s23 = int_to_ptr.vmem [resolvable:$true] %s373_s23 }
  0x72   :  { %493 = vmatpush3.bf16.msra.mxu1 %v492_v14  ;;  %v103_v23 = vld [vmem:[#allocation2] sm:$0xff]  ;;  %v498_v24 = vpack.c.bf16 %v285_v21, %v284_v20  ;;  %v287_v26 = vld [vmem:[#allocation11 + $0x38] sm:$0xff]  ;;  %v288_v29 = vld [vmem:[#allocation11 + $0x40] sm:$0xff]  ;;  %s661_s0 = scalar_lea.vmem %s374_s23, 128  ;;  %p666_p7 = scmp.lt.s32.totalorder %s374_s23, %s374_s23 }
  0x73   :  { %494 = vmatprep.subr.bf16.mxu1 %v701_v0  ;;  %v501_v27 = vpack.c.bf16 %v287_v26, %v286_v25  ;;  %v104_v28 = vld [vmem:[#allocation7] sm:$0xff]  ;;  %v289_v30 = vld [vmem:[#allocation11 + $0x48] sm:$0xff]  ;;  %v290_v32 = vld [vmem:[#allocation11 + $0x50] sm:$0xff]  ;;  %p662_p6 = scmp.ne.s32.totalorder %s374_s23, %s661_s0  ;;  %p667_p8 = scmp.lt.s32.totalorder %s661_s0, %s661_s0 }
  0x74   :  { %482 = vmatpush3.bf16.msra.mxu0 %v479_v7  ;;  %v504_v31 = vpack.c.bf16 %v289_v30, %v288_v29  ;;  %v291_v33 = vld [vmem:[#allocation11 + $0x58] sm:$0xff]  ;;  %v292_v35 = vld [vmem:[#allocation11 + $0x60] sm:$0xff]  ;;  %v293_v36 = vld [vmem:[#allocation11 + $0x68] sm:$0xff] }
  0x75   :  { %484 = vmatprep.subr.bf16.mxu0 %v483_v13  ;;  %v507_v34 = vpack.c.bf16 %v291_v33, %v290_v32  ;;  %v510_v37 = vpack.c.bf16 %v293_v36, %v292_v35  ;;  %v294_v38 = vld [vmem:[#allocation11 + $0x70] sm:$0xff]  ;;  %v295_v39 = vld [vmem:[#allocation11 + $0x78] sm:$0xff]  ;;  %p668_p9 = por %p667_p8, %p666_p7 }
  0x76   :  { %496 = vmatpush3.bf16.msra.mxu1 %v495_v18  ;;  %v513_v40 = vpack.c.bf16 %v295_v39, %v294_v38 }
  0x77   :  { %427 = vmatmul.mubr.msk.f32.vlgmr.msra.gmra.mrb[0].mxu0 %vm115_vm0, %v106_v19  ;;  %497 = vmatprep.subr.bf16.mxu1 %v701_v0  ;;  %p669_p10 = pnand %p668_p9, %p662_p6 }
  0x78   :  { %486 = vmatpush3.bf16.msra.mxu0 %v483_v13  ;;  %437 = vmatprep.mubr.msk.f32.mxu0 %vm115_vm0, %v103_v23 }
  0x79   :  { %488 = vmatprep.subr.bf16.mxu0 %v487_v22 }
  0x7a   :  { %499 = vmatpush3.bf16.msra.mxu1 %v498_v24 }
  0x7b   :  { %500 = vmatprep.subr.bf16.mxu1 %v701_v0 }
  0x7c   :  { %490 = vmatpush3.bf16.msra.mxu0 %v487_v22 }
  0x7e   :  { %502 = vmatpush3.bf16.msra.mxu1 %v501_v27 }
  0x7f   :  { %438 = vmatmul.mubr.msk.f32.vlgmr.msra.gmra.mrb[0].mxu0 %vm115_vm0, %v104_v28  ;;  %503 = vmatprep.subr.bf16.mxu1 %v701_v0 }
  0x82   :  { %505 = vmatpush3.bf16.msra.mxu1 %v504_v31 }
  0x83   :  { %506 = vmatprep.subr.bf16.mxu1 %v701_v0 }
  0x86   :  { %508 = vmatpush3.bf16.msra.mxu1 %v507_v34 }
  0x87   :  { %509 = vmatprep.subr.bf16.mxu1 %v701_v0 }
  0x8a   :  { %511 = vmatpush3.bf16.msra.mxu1 %v510_v37 }
  0x8b   :  { %512 = vmatprep.subr.bf16.mxu1 %v701_v0 }
  0x8e   :  { %514 = vmatpush3.bf16.msra.mxu1 %v513_v40 }
 0x152   :  { %v439_v42 = vpop.f32.mrb[0].mxu0 }
 0x153   :  { %v269_v43 = vpop.f32.mrb[1].mxu0 }
 0x154   :  { %v278_v44 = vmin.f32 %v269_v43, %v439_v42 }
 0x156   :  { %v279_v45 = vmax.f32 %v278_v44, 0.0 }
 0x158   :  { %473 = vmatmul.mubr.f32.vlgmr.msra.gmra.mrb[0].mxu1 %v279_v45 }
 0x22b   :  { %v362_v46 = vpop.f32.mrb[0].mxu1 }
 0x22c   :  { %366 = vst [vmem:[#allocation13] sm:$0xff] %v362_v46  ;;  %v474_v47 = vpop.f32.mrb[1].mxu1 }
 0x22d   :  { %672 = shalt.err (!%p669_p10)
}
 0x22e   :  { %s673_s28 = scalar_lea.hbm %s874_s7, 128 }
 0x22f   :  { %p674_p11 = scmp.ne.s32.totalorder %s874_s7, %s673_s28  ;;  %p677_p12 = scmp.lt.u32.totalorder %s673_s28, %s874_s7 }
 0x231   :  { %p679_p13 = pnand %p677_p12, %p674_p11 }
 0x233   :  { %682 = shalt.err (!%p679_p13)
}
 0x234   :  { %376 = dma.vmem_to_hbm [thread:$0]  %s374_s23, 128, %s874_s7, [#allocation4]  }
 0x235   :  { %691 = dma.done.wait [#allocation4], 128  }
 0x236   :  { %692 = vsyncadd [#allocation4], 4294967168 }
 0x237   :  { %380 = vsyncpa [#allocation3], 1 }
 0x238   :  { %381 = vsyncpa [#allocation6], 1 }
 0x239   :  { %382 = vsyncpa [#allocation9], 1 }
 0x23a   :  { %383 = vsyncpa [#allocation12], 1 }
 0x23b   :  { %384 = vsyncpa [#allocation4], 1 }

</bundles_post_ra>
